<compile_context>
chip_gen: v7x
topology: tpu7x:2x2x1
jax: 0.10.0
libtpu: 0.0.40
codegen_flags: <defaults>
</compile_context>

<pallas_src>
import functools

import jax
import jax.numpy as jnp
from jax import lax
from jax.experimental import pallas as pl
from jax.experimental.pallas import tpu as pltpu


# ----------------------------------------------------------------------------
# Fused per-(batch, time-chunk) kernel
# ----------------------------------------------------------------------------
def _hyena_experts_kernel(u_ref, w_in_ref, b_in_ref, sfw_ref, sfb_ref,
                          k_ref, kb_ref, wr_ref, br_ref, w_big_ref, bo_ref,
                          o_ref, sfpad_ref, vhist_ref, *,
                          order, head_dim, K, Tc,
                          num_experts, active_experts, dim_inner):
    j = pl.program_id(1)                              # time-chunk index
    Dt = (order + 1) * head_dim

    # ---- reset per-sequence carried state at the first chunk ---------------
    @pl.when(j == 0)
    def _():
        sfpad_ref[:K - 1, :] = jnp.zeros((K - 1, Dt), jnp.float32)
        for o in range(order - 1):
            vhist_ref[o, :Tc, :] = jnp.zeros((Tc, head_dim), jnp.float32)

    u_c = u_ref[0]                                    # (Tc, dim)  bf16

    # ---- input projection (MXU, bf16 x bf16 -> f32 accumulate) -------------
    up = (jnp.dot(u_c, w_in_ref[...], preferred_element_type=jnp.float32)
          + b_in_ref[...])                            # (Tc, Dt) f32

    # ---- depthwise causal short filter via carried halo (no masks) ---------
    # sfpad rows [0, K-1) hold the last K-1 in_proj rows of the previous chunk
    # (zeros for the first chunk == Conv1d zero padding); rows [K-1, Tc+K-1)
    # hold the current chunk.
    sfpad_ref[K - 1:, :] = up
    uc = jnp.broadcast_to(sfb_ref[...], (Tc, Dt))
    for t in range(K):                                # K small & static
        uc = uc + sfw_ref[t:t + 1, :] * sfpad_ref[t:t + Tc, :]
    sfpad_ref[:K - 1, :] = up[Tc - (K - 1):, :]       # carry halo for next chunk

    # ---- split channel groups x_0..x_{order-1}, v ---------------------------
    xs = [uc[:, g * head_dim:(g + 1) * head_dim] for g in range(order + 1)]
    x, v = xs[:order], xs[order]                      # each (Tc, head_dim)

    # ---- hyena recurrence: gate -> causal long conv (chunked lag sweep) -----
    #   y[T, c] = bias[c]*vg[T, c] + sum_{d=0..T} k[c, d] * vg[T-d, c]
    # vhist rows [0, Tc) are zero padding; global time t lives at row Tc + t,
    # so negative source times automatically contribute zero.
    base = pl.multiple_of(j * Tc, Tc)
    for o in range(order - 1):
        x_i = x[order - 1 - o]                        # reversed(x[1:])
        vg = v * x_i                                  # gated v   (Tc, hd)
        vhist_ref[o, pl.ds(Tc + base, Tc), :] = vg    # append to history
        y0 = kb_ref[o] * vg                           # (1,hd) * (Tc,hd)

        def lag_body(d, y, _o=o):
            kd = k_ref[_o, pl.ds(d, 1), :]                        # (1, hd)
            src = vhist_ref[_o, pl.ds(Tc + base - d, Tc), :]      # (Tc, hd)
            return y + kd * src

        v = lax.fori_loop(0, (j + 1) * Tc, lag_body, y0)

    y_head = v * x[0]                                 # (Tc, head_dim == dim)

    # ---- router + top-k gate (f32 accumulation) -----------------------------
    scores = (jnp.dot(u_c, wr_ref[...], preferred_element_type=jnp.float32)
              + br_ref[...])                          # (Tc, E)
    eidx = lax.broadcasted_iota(jnp.int32, scores.shape, 1)
    work = scores
    min_score = scores[:, :1]
    for i in range(active_experts):                   # min of top-k values
        cur = jnp.max(work, axis=-1, keepdims=True)
        min_score = cur
        if i + 1 < active_experts:
            is_max = work == cur
            first = jnp.min(jnp.where(is_max, eidx, num_experts),
                            axis=-1, keepdims=True)
            work = jnp.where(eidx == first, -jnp.inf, work)

    # torch: where(scores < min_score, 0, scores), then softmax over experts
    gated = jnp.where(scores < min_score, 0.0, scores)
    m = jnp.max(gated, axis=-1, keepdims=True)
    e = jnp.exp(gated - m)
    probs = e / jnp.sum(e, axis=-1, keepdims=True)    # (Tc, E)

    # ---- expert mixing fused into the output projection ---------------------
    #   y.reshape(Tc, dim_inner, E) * probs -> sum over E -> @ W_o^T
    # == (y * probs_tiled) @ W_big, probs_tiled[t, d] = probs[t, d % E],
    #    W_big[d, :] = W_o[:, d // E]   (precomputed in the wrapper).
    probs_tiled = jnp.tile(probs, (1, dim_inner))     # (Tc, dim), lane replication
    y_gated = y_head * probs_tiled
    out = (jnp.dot(y_gated.astype(w_big_ref.dtype), w_big_ref[...],
                   preferred_element_type=jnp.float32) + bo_ref[...])
    o_ref[0] = out.astype(o_ref.dtype)


# ----------------------------------------------------------------------------
# Wrapper: parameter preprocessing (layout / fusion) + pallas_call
# ----------------------------------------------------------------------------
def hyena_experts_forward(u, params, *, order, num_experts, active_experts,
                          dim_inner, max_length, chunk=None,
                          matmul_dtype=jnp.bfloat16):
    B, L, dim = u.shape
    assert dim == dim_inner * num_experts, "module requires dim == dim_inner * num_experts"
    assert L <= max_length
    head_dim = dim                                    # num_heads=1, inner_factor=1
    Dt = (order + 1) * head_dim
    E = num_experts
    K = params["sf_w"].shape[1]
    assert K >= 2
    Tc = chunk if chunk is not None else min(L, 128)
    assert L % Tc == 0 and Tc % 8 == 0 and Tc >= K - 1
    NC = L // Tc

    # One-time parameter preprocessing (outside the kernel).
    w_in_t = params["w_in"].T.astype(matmul_dtype)                 # (dim, Dt)
    b_in = params["b_in"][None, :].astype(jnp.float32)             # (1, Dt)
    sf_w_t = params["sf_w"].T.astype(jnp.float32)                  # (K, Dt)
    sf_b = params["sf_b"][None, :].astype(jnp.float32)             # (1, Dt)
    k_tm = jnp.transpose(params["k_long"][:, :, :L],
                         (0, 2, 1)).astype(jnp.float32)            # (o-1, L, hd)
    k_bias = params["k_bias"][:, None, :].astype(jnp.float32)      # (o-1, 1, hd)
    wr_t = params["w_r"].T.astype(matmul_dtype)                    # (dim, E)
    br = params["b_r"][None, :].astype(jnp.float32)                # (1, E)
    w_big = params["w_o"].T[jnp.arange(dim) // E].astype(matmul_dtype)  # (dim, dim)
    b_o = params["b_o"][None, :].astype(jnp.float32)               # (1, dim)

    kernel = functools.partial(
        _hyena_experts_kernel, order=order, head_dim=head_dim, K=K, Tc=Tc,
        num_experts=num_experts, active_experts=active_experts,
        dim_inner=dim_inner)

    return pl.pallas_call(
        kernel,
        out_shape=jax.ShapeDtypeStruct((B, L, dim), jnp.float32),
        grid=(B, NC),
        in_specs=[
            pl.BlockSpec((1, Tc, dim), lambda b, j: (b, j, 0)),                # u chunk
            pl.BlockSpec((dim, Dt), lambda b, j: (0, 0)),                      # W_in^T
            pl.BlockSpec((1, Dt), lambda b, j: (0, 0)),                        # b_in
            pl.BlockSpec((K, Dt), lambda b, j: (0, 0)),                        # short filt w
            pl.BlockSpec((1, Dt), lambda b, j: (0, 0)),                        # short filt b
            pl.BlockSpec((order - 1, L, head_dim), lambda b, j: (0, 0, 0)),    # k (time-major)
            pl.BlockSpec((order - 1, 1, head_dim), lambda b, j: (0, 0, 0)),    # long-conv bias
            pl.BlockSpec((dim, E), lambda b, j: (0, 0)),                       # router W^T
            pl.BlockSpec((1, E), lambda b, j: (0, 0)),                         # router b
            pl.BlockSpec((dim, dim), lambda b, j: (0, 0)),                     # fused S@W_o^T
            pl.BlockSpec((1, dim), lambda b, j: (0, 0)),                       # b_o
        ],
        out_specs=pl.BlockSpec((1, Tc, dim), lambda b, j: (b, j, 0)),
        scratch_shapes=[
            pltpu.VMEM((Tc + K - 1, Dt), jnp.float32),                 # short-filter pad/halo
            pltpu.VMEM((order - 1, L + Tc, head_dim), jnp.float32),    # gated-v history
        ],
        compiler_params=pltpu.CompilerParams(
            dimension_semantics=("parallel", "arbitrary"),
            vmem_limit_bytes=48 * 1024 * 1024),
    )(u.astype(matmul_dtype), w_in_t, b_in, sf_w_t, sf_b, k_tm, k_bias,
      wr_t, br, w_big, b_o)


if __name__ == "__main__":
    # Small shapes consistent with the module: dim must equal dim_inner*num_experts.
    B, L = 2, 16
    order = 2
    num_experts = 8
    active_experts = 2
    dim_inner = 4
    dim = dim_inner * num_experts                    # 32
    max_length = 16
    K = 3                                            # short_filter_order
    Dt = (order + 1) * dim                           # 96

    key = jax.random.PRNGKey(0)
    ks = jax.random.split(key, 11)
    scale = 0.1
    u = jax.random.normal(ks[0], (B, L, dim), dtype=jnp.float32)

    params = dict(
        w_in=jax.random.normal(ks[1], (Dt, dim), dtype=jnp.float32) * scale,
        b_in=jax.random.normal(ks[2], (Dt,), dtype=jnp.float32) * scale,
        sf_w=jax.random.normal(ks[3], (Dt, K), dtype=jnp.float32) * scale,
        sf_b=jax.random.normal(ks[4], (Dt,), dtype=jnp.float32) * scale,
        k_long=jax.random.normal(ks[5], (order - 1, dim, max_length),
                                 dtype=jnp.float32) * scale,
        k_bias=jax.random.normal(ks[6], (order - 1, dim),
                                 dtype=jnp.float32) * scale,
        w_r=jax.random.normal(ks[7], (num_experts, dim), dtype=jnp.float32) * scale,
        b_r=jax.random.normal(ks[8], (num_experts,), dtype=jnp.float32) * scale,
        w_o=jax.random.normal(ks[9], (dim, dim_inner), dtype=jnp.float32) * scale,
        b_o=jax.random.normal(ks[10], (dim,), dtype=jnp.float32) * scale,
    )

    # chunk=8 -> 2 time chunks per sequence, exercising the chunked-conv /
    # halo / history-carry path.
    y = hyena_experts_forward(u, params, order=order, num_experts=num_experts,
                              active_experts=active_experts,
                              dim_inner=dim_inner, max_length=max_length,
                              chunk=8)
    y = jax.block_until_ready(y)

    assert y.shape == (B, L, dim), y.shape
    assert bool(jnp.all(jnp.isfinite(y)))
    print("KERNEL_OK")
</pallas_src>

<mosaic_0001>
module attributes {stable_mosaic.version = 11 : i64} {
  func.func @_hyena_experts_kernel(%arg0: i32, %arg1: i32, %arg2: memref<1x8x32xbf16, #tpu.memory_space<vmem>>, %arg3: memref<32x96xbf16, #tpu.memory_space<vmem>>, %arg4: memref<1x96xf32, #tpu.memory_space<vmem>>, %arg5: memref<3x96xf32, #tpu.memory_space<vmem>>, %arg6: memref<1x96xf32, #tpu.memory_space<vmem>>, %arg7: memref<1x16x32xf32, #tpu.memory_space<vmem>>, %arg8: memref<1x1x32xf32, #tpu.memory_space<vmem>>, %arg9: memref<32x8xbf16, #tpu.memory_space<vmem>>, %arg10: memref<1x8xf32, #tpu.memory_space<vmem>>, %arg11: memref<32x32xbf16, #tpu.memory_space<vmem>>, %arg12: memref<1x32xf32, #tpu.memory_space<vmem>>, %arg13: memref<1x8x32xf32, #tpu.memory_space<vmem>>, %arg14: memref<10x96xf32, #tpu.memory_space<vmem>>, %arg15: memref<1x24x32xf32, #tpu.memory_space<vmem>>) attributes {dimension_semantics = [#tpu.dimension_semantics<parallel>, #tpu.dimension_semantics<arbitrary>], iteration_bounds = array<i64: 2, 2>, scalar_prefetch = 0 : i64, scratch_operands = 2 : i64, tpu.core_type = #tpu.core_type<tc>, window_params = [{transform_indices = @transform_0, window_bounds = array<i64: 1, 8, 32>}, {pipeline_mode = #tpu.pipeline_mode<synchronous>, transform_indices = @transform_1, window_bounds = array<i64: 32, 96>}, {pipeline_mode = #tpu.pipeline_mode<synchronous>, transform_indices = @transform_2, window_bounds = array<i64: 1, 96>}, {pipeline_mode = #tpu.pipeline_mode<synchronous>, transform_indices = @transform_3, window_bounds = array<i64: 3, 96>}, {pipeline_mode = #tpu.pipeline_mode<synchronous>, transform_indices = @transform_4, window_bounds = array<i64: 1, 96>}, {pipeline_mode = #tpu.pipeline_mode<synchronous>, transform_indices = @transform_5, window_bounds = array<i64: 1, 16, 32>}, {pipeline_mode = #tpu.pipeline_mode<synchronous>, transform_indices = @transform_6, window_bounds = array<i64: 1, 1, 32>}, {pipeline_mode = #tpu.pipeline_mode<synchronous>, transform_indices = @transform_7, window_bounds = array<i64: 32, 8>}, {pipeline_mode = #tpu.pipeline_mode<synchronous>, transform_indices = @transform_8, window_bounds = array<i64: 1, 8>}, {pipeline_mode = #tpu.pipeline_mode<synchronous>, transform_indices = @transform_9, window_bounds = array<i64: 32, 32>}, {pipeline_mode = #tpu.pipeline_mode<synchronous>, transform_indices = @transform_10, window_bounds = array<i64: 1, 32>}, {transform_indices = @transform_11, window_bounds = array<i64: 1, 8, 32>}]} {
    %c0_i32 = arith.constant 0 : i32
    %0 = arith.cmpi eq, %arg1, %c0_i32 : i32
    %1 = arith.extui %0 : i1 to i32
    %c0_i32_0 = arith.constant 0 : i32
    %2 = arith.cmpi ne, %1, %c0_i32_0 : i32
    scf.if %2 {
      %cst_53 = arith.constant 0.000000e+00 : f32
      %96 = vector.broadcast %cst_53 : f32 to vector<2x96xf32>
      %c0_54 = arith.constant 0 : index
      %c0_55 = arith.constant 0 : index
      %97 = vector.load %arg14[%c0_54, %c0_55] : memref<10x96xf32, #tpu.memory_space<vmem>>, vector<2x96xf32>
      tpu.vector_store %arg14[%c0_54, %c0_55], %96 {strides = array<i32>} : memref<10x96xf32, #tpu.memory_space<vmem>>, vector<2x96xf32>,
      %cst_56 = arith.constant 0.000000e+00 : f32
      %98 = vector.broadcast %cst_56 : f32 to vector<8x32xf32>
      %c0_57 = arith.constant 0 : index
      %c0_58 = arith.constant 0 : index
      %c0_59 = arith.constant 0 : index
      %99 = vector.load %arg15[%c0_57, %c0_58, %c0_59] : memref<1x24x32xf32, #tpu.memory_space<vmem>>, vector<1x8x32xf32>
      %100 = vector.shape_cast %99 : vector<1x8x32xf32> to vector<8x32xf32>
      %101 = vector.shape_cast %98 : vector<8x32xf32> to vector<1x8x32xf32>
      tpu.vector_store %arg15[%c0_57, %c0_58, %c0_59], %101 {strides = array<i32>} : memref<1x24x32xf32, #tpu.memory_space<vmem>>, vector<1x8x32xf32>,
    } else {
    }
    %c0 = arith.constant 0 : index
    %c0_1 = arith.constant 0 : index
    %c0_2 = arith.constant 0 : index
    %3 = vector.load %arg2[%c0, %c0_1, %c0_2] : memref<1x8x32xbf16, #tpu.memory_space<vmem>>, vector<1x8x32xbf16>
    %4 = vector.shape_cast %3 : vector<1x8x32xbf16> to vector<8x32xbf16>
    %c0_3 = arith.constant 0 : index
    %c0_4 = arith.constant 0 : index
    %5 = vector.load %arg3[%c0_3, %c0_4] : memref<32x96xbf16, #tpu.memory_space<vmem>>, vector<32x96xbf16>
    %cst = arith.constant dense<0.000000e+00> : vector<8x96xf32>
    %6 = tpu.matmul %4, %5, %cst {dimension_numbers = #tpu.dot_dimension_numbers<[1], [0], [0], [1], [0, 0, 1, 1], [], []>} : vector<8x32xbf16>, vector<32x96xbf16>, vector<8x96xf32> -> vector<8x96xf32>
    %c0_5 = arith.constant 0 : index
    %c0_6 = arith.constant 0 : index
    %7 = vector.load %arg4[%c0_5, %c0_6] : memref<1x96xf32, #tpu.memory_space<vmem>>, vector<1x96xf32>
    %8 = vector.broadcast %7 : vector<1x96xf32> to vector<8x96xf32>
    %9 = arith.addf %6, %8 : vector<8x96xf32>
    %c2 = arith.constant 2 : index
    %c0_7 = arith.constant 0 : index
    %10 = vector.load %arg14[%c2, %c0_7] : memref<10x96xf32, #tpu.memory_space<vmem>>, vector<8x96xf32>
    tpu.vector_store %arg14[%c2, %c0_7], %9 {strides = array<i32>} : memref<10x96xf32, #tpu.memory_space<vmem>>, vector<8x96xf32>,
    %c0_8 = arith.constant 0 : index
    %c0_9 = arith.constant 0 : index
    %11 = vector.load %arg6[%c0_8, %c0_9] : memref<1x96xf32, #tpu.memory_space<vmem>>, vector<1x96xf32>
    %12 = vector.shape_cast %11 : vector<1x96xf32> to vector<1x96xf32>
    %13 = vector.broadcast %12 : vector<1x96xf32> to vector<8x96xf32>
    %c0_10 = arith.constant 0 : index
    %c0_11 = arith.constant 0 : index
    %14 = vector.load %arg5[%c0_10, %c0_11] : memref<3x96xf32, #tpu.memory_space<vmem>>, vector<1x96xf32>
    %c0_12 = arith.constant 0 : index
    %c0_13 = arith.constant 0 : index
    %15 = vector.load %arg14[%c0_12, %c0_13] : memref<10x96xf32, #tpu.memory_space<vmem>>, vector<8x96xf32>
    %16 = vector.broadcast %14 : vector<1x96xf32> to vector<8x96xf32>
    %17 = arith.mulf %16, %15 : vector<8x96xf32>
    %18 = arith.addf %13, %17 : vector<8x96xf32>
    %c1 = arith.constant 1 : index
    %c0_14 = arith.constant 0 : index
    %19 = vector.load %arg5[%c1, %c0_14] : memref<3x96xf32, #tpu.memory_space<vmem>>, vector<1x96xf32>
    %c1_15 = arith.constant 1 : index
    %c0_16 = arith.constant 0 : index
    %20 = vector.load %arg14[%c1_15, %c0_16] : memref<10x96xf32, #tpu.memory_space<vmem>>, vector<8x96xf32>
    %21 = vector.broadcast %19 : vector<1x96xf32> to vector<8x96xf32>
    %22 = arith.mulf %21, %20 : vector<8x96xf32>
    %23 = arith.addf %18, %22 : vector<8x96xf32>
    %c2_17 = arith.constant 2 : index
    %c0_18 = arith.constant 0 : index
    %24 = vector.load %arg5[%c2_17, %c0_18] : memref<3x96xf32, #tpu.memory_space<vmem>>, vector<1x96xf32>
    %c2_19 = arith.constant 2 : index
    %c0_20 = arith.constant 0 : index
    %25 = vector.load %arg14[%c2_19, %c0_20] : memref<10x96xf32, #tpu.memory_space<vmem>>, vector<8x96xf32>
    %26 = vector.broadcast %24 : vector<1x96xf32> to vector<8x96xf32>
    %27 = arith.mulf %26, %25 : vector<8x96xf32>
    %28 = arith.addf %23, %27 : vector<8x96xf32>
    %29 = vector.extract_strided_slice %9 {offsets = [6, 0], sizes = [2, 96], strides = [1, 1]} : vector<8x96xf32> to vector<2x96xf32>
    %c0_21 = arith.constant 0 : index
    %c0_22 = arith.constant 0 : index
    %30 = vector.load %arg14[%c0_21, %c0_22] : memref<10x96xf32, #tpu.memory_space<vmem>>, vector<2x96xf32>
    tpu.vector_store %arg14[%c0_21, %c0_22], %29 {strides = array<i32>} : memref<10x96xf32, #tpu.memory_space<vmem>>, vector<2x96xf32>,
    %31 = vector.extract_strided_slice %28 {offsets = [0, 0], sizes = [8, 32], strides = [1, 1]} : vector<8x96xf32> to vector<8x32xf32>
    %32 = vector.extract_strided_slice %28 {offsets = [0, 32], sizes = [8, 32], strides = [1, 1]} : vector<8x96xf32> to vector<8x32xf32>
    %33 = vector.extract_strided_slice %28 {offsets = [0, 64], sizes = [8, 32], strides = [1, 1]} : vector<8x96xf32> to vector<8x32xf32>
    %c8_i32 = arith.constant 8 : i32
    %34 = arith.muli %arg1, %c8_i32 : i32
    %35 = tpu.assume_multiple %34, 8 : i32
    %36 = arith.mulf %33, %32 : vector<8x32xf32>
    %c8_i32_23 = arith.constant 8 : i32
    %37 = arith.addi %c8_i32_23, %35 : i32
    %c0_24 = arith.constant 0 : index
    %38 = arith.index_cast %37 : i32 to index
    %c0_25 = arith.constant 0 : index
    %39 = vector.load %arg15[%c0_24, %38, %c0_25] : memref<1x24x32xf32, #tpu.memory_space<vmem>>, vector<1x8x32xf32>
    %40 = vector.shape_cast %39 : vector<1x8x32xf32> to vector<8x32xf32>
    %41 = vector.shape_cast %36 : vector<8x32xf32> to vector<1x8x32xf32>
    tpu.vector_store %arg15[%c0_24, %38, %c0_25], %41 {strides = array<i32>} : memref<1x24x32xf32, #tpu.memory_space<vmem>>, vector<1x8x32xf32>,
    %c0_26 = arith.constant 0 : index
    %c0_27 = arith.constant 0 : index
    %c0_28 = arith.constant 0 : index
    %42 = vector.load %arg8[%c0_26, %c0_27, %c0_28] : memref<1x1x32xf32, #tpu.memory_space<vmem>>, vector<1x1x32xf32>
    %43 = vector.shape_cast %42 : vector<1x1x32xf32> to vector<1x32xf32>
    %44 = vector.broadcast %43 : vector<1x32xf32> to vector<8x32xf32>
    %45 = arith.mulf %44, %36 : vector<8x32xf32>
    %c1_i32 = arith.constant 1 : i32
    %46 = arith.addi %arg1, %c1_i32 : i32
    %c8_i32_29 = arith.constant 8 : i32
    %47 = arith.muli %46, %c8_i32_29 : i32
    %c0_i32_30 = arith.constant 0 : i32
    %48 = arith.subi %47, %c0_i32_30 : i32
    %49 = arith.addi %c0_i32_30, %48 : i32
    %c1_i32_31 = arith.constant 1 : i32
    %50 = scf.for %arg16 = %c0_i32_30 to %49 step %c1_i32_31 iter_args(%arg17 = %45) -> (vector<8x32xf32>)  : i32 {
      %c0_53 = arith.constant 0 : index
      %96 = arith.index_cast %arg16 : i32 to index
      %c0_54 = arith.constant 0 : index
      %97 = vector.load %arg7[%c0_53, %96, %c0_54] : memref<1x16x32xf32, #tpu.memory_space<vmem>>, vector<1x1x32xf32>
      %98 = vector.shape_cast %97 : vector<1x1x32xf32> to vector<1x32xf32>
      %c8_i32_55 = arith.constant 8 : i32
      %99 = arith.addi %c8_i32_55, %35 : i32
      %100 = arith.subi %99, %arg16 : i32
      %c0_56 = arith.constant 0 : index
      %101 = arith.index_cast %100 : i32 to index
      %c0_57 = arith.constant 0 : index
      %102 = vector.load %arg15[%c0_56, %101, %c0_57] : memref<1x24x32xf32, #tpu.memory_space<vmem>>, vector<1x8x32xf32>
      %103 = vector.shape_cast %102 : vector<1x8x32xf32> to vector<8x32xf32>
      %104 = vector.broadcast %98 : vector<1x32xf32> to vector<8x32xf32>
      %105 = arith.mulf %104, %103 : vector<8x32xf32>
      %106 = arith.addf %arg17, %105 : vector<8x32xf32>
      scf.yield %106 : vector<8x32xf32>
    }
    %51 = arith.mulf %50, %31 : vector<8x32xf32>
    %c0_32 = arith.constant 0 : index
    %c0_33 = arith.constant 0 : index
    %52 = vector.load %arg9[%c0_32, %c0_33] : memref<32x8xbf16, #tpu.memory_space<vmem>>, vector<32x8xbf16>
    %cst_34 = arith.constant dense<0.000000e+00> : vector<8x8xf32>
    %53 = tpu.matmul %4, %52, %cst_34 {dimension_numbers = #tpu.dot_dimension_numbers<[1], [0], [0], [1], [0, 0, 1, 1], [], []>} : vector<8x32xbf16>, vector<32x8xbf16>, vector<8x8xf32> -> vector<8x8xf32>
    %c0_35 = arith.constant 0 : index
    %c0_36 = arith.constant 0 : index
    %54 = vector.load %arg10[%c0_35, %c0_36] : memref<1x8xf32, #tpu.memory_space<vmem>>, vector<1x8xf32>
    %55 = vector.broadcast %54 : vector<1x8xf32> to vector<8x8xf32>
    %56 = arith.addf %53, %55 : vector<8x8xf32>
    %57 = tpu.iota {dimensions = array<i32: 1>} : vector<8x8xi32>
    %cst_37 = arith.constant dense<0xFF800000> : vector<8xf32>
    %58 = vector.multi_reduction <maximumf>, %56, %cst_37 [1] : vector<8x8xf32> to vector<8xf32>
    %59 = vector.shape_cast %58 : vector<8xf32> to vector<8x1xf32>
    %60 = vector.broadcast %59 : vector<8x1xf32> to vector<8x8xf32>
    %61 = arith.cmpf oeq, %56, %60 : vector<8x8xf32>
    %c8_i32_38 = arith.constant 8 : i32
    %62 = vector.broadcast %c8_i32_38 : i32 to vector<8x8xi32>
    %63 = arith.select %61, %57, %62 : vector<8x8xi1>, vector<8x8xi32>
    %cst_39 = arith.constant dense<2147483647> : vector<8xi32>
    %64 = vector.multi_reduction <minsi>, %63, %cst_39 [1] : vector<8x8xi32> to vector<8xi32>
    %65 = vector.shape_cast %64 : vector<8xi32> to vector<8x1xi32>
    %66 = vector.broadcast %65 : vector<8x1xi32> to vector<8x8xi32>
    %67 = arith.cmpi eq, %57, %66 : vector<8x8xi32>
    %cst_40 = arith.constant 0xFF800000 : f32
    %68 = vector.broadcast %cst_40 : f32 to vector<8x8xf32>
    %69 = arith.select %67, %68, %56 : vector<8x8xi1>, vector<8x8xf32>
    %cst_41 = arith.constant dense<0xFF800000> : vector<8xf32>
    %70 = vector.multi_reduction <maximumf>, %69, %cst_41 [1] : vector<8x8xf32> to vector<8xf32>
    %71 = vector.shape_cast %70 : vector<8xf32> to vector<8x1xf32>
    %72 = vector.broadcast %71 : vector<8x1xf32> to vector<8x8xf32>
    %73 = arith.cmpf olt, %56, %72 : vector<8x8xf32>
    %cst_42 = arith.constant 0.000000e+00 : f32
    %74 = vector.broadcast %cst_42 : f32 to vector<8x8xf32>
    %75 = arith.select %73, %74, %56 : vector<8x8xi1>, vector<8x8xf32>
    %cst_43 = arith.constant dense<0xFF800000> : vector<8xf32>
    %76 = vector.multi_reduction <maximumf>, %75, %cst_43 [1] : vector<8x8xf32> to vector<8xf32>
    %77 = vector.shape_cast %76 : vector<8xf32> to vector<8x1xf32>
    %78 = vector.broadcast %77 : vector<8x1xf32> to vector<8x8xf32>
    %79 = arith.subf %75, %78 : vector<8x8xf32>
    %80 = math.exp %79 : vector<8x8xf32>
    %cst_44 = arith.constant dense<0.000000e+00> : vector<8xf32>
    %81 = vector.multi_reduction <add>, %80, %cst_44 [1] : vector<8x8xf32> to vector<8xf32>
    %82 = vector.shape_cast %81 : vector<8xf32> to vector<8x1xf32>
    %83 = vector.broadcast %82 : vector<8x1xf32> to vector<8x8xf32>
    %84 = arith.divf %80, %83 : vector<8x8xf32>
    %85 = tpu.concatenate %84, %84, %84, %84 in 1 : vector<8x8xf32>, vector<8x8xf32>, vector<8x8xf32>, vector<8x8xf32> -> vector<8x32xf32>
    %86 = arith.mulf %51, %85 : vector<8x32xf32>
    %87 = arith.truncf %86 : vector<8x32xf32> to vector<8x32xbf16>
    %c0_45 = arith.constant 0 : index
    %c0_46 = arith.constant 0 : index
    %88 = vector.load %arg11[%c0_45, %c0_46] : memref<32x32xbf16, #tpu.memory_space<vmem>>, vector<32x32xbf16>
    %cst_47 = arith.constant dense<0.000000e+00> : vector<8x32xf32>
    %89 = tpu.matmul %87, %88, %cst_47 {dimension_numbers = #tpu.dot_dimension_numbers<[1], [0], [0], [1], [0, 0, 1, 1], [], []>} : vector<8x32xbf16>, vector<32x32xbf16>, vector<8x32xf32> -> vector<8x32xf32>
    %c0_48 = arith.constant 0 : index
    %c0_49 = arith.constant 0 : index
    %90 = vector.load %arg12[%c0_48, %c0_49] : memref<1x32xf32, #tpu.memory_space<vmem>>, vector<1x32xf32>
    %91 = vector.broadcast %90 : vector<1x32xf32> to vector<8x32xf32>
    %92 = arith.addf %89, %91 : vector<8x32xf32>
    %c0_50 = arith.constant 0 : index
    %c0_51 = arith.constant 0 : index
    %c0_52 = arith.constant 0 : index
    %93 = vector.load %arg13[%c0_50, %c0_51, %c0_52] : memref<1x8x32xf32, #tpu.memory_space<vmem>>, vector<1x8x32xf32>
    %94 = vector.shape_cast %93 : vector<1x8x32xf32> to vector<8x32xf32>
    %95 = vector.shape_cast %92 : vector<8x32xf32> to vector<1x8x32xf32>
    tpu.vector_store %arg13[%c0_50, %c0_51, %c0_52], %95 {strides = array<i32>} : memref<1x8x32xf32, #tpu.memory_space<vmem>>, vector<1x8x32xf32>,
    return
  }
  func.func @transform_0(%arg0: i32, %arg1: i32) -> (i32, i32, i32) {
    %c0_i32 = arith.constant 0 : i32
    %c0_i32_0 = arith.constant 0 : i32
    return %arg0, %arg1, %c0_i32 : i32, i32, i32
  }
  func.func @transform_1(%arg0: i32, %arg1: i32) -> (i32, i32) {
    %c0_i32 = arith.constant 0 : i32
    %c0_i32_0 = arith.constant 0 : i32
    %c0_i32_1 = arith.constant 0 : i32
    return %c0_i32, %c0_i32_0 : i32, i32
  }
  func.func @transform_2(%arg0: i32, %arg1: i32) -> (i32, i32) {
    %c0_i32 = arith.constant 0 : i32
    %c0_i32_0 = arith.constant 0 : i32
    %c0_i32_1 = arith.constant 0 : i32
    return %c0_i32, %c0_i32_0 : i32, i32
  }
  func.func @transform_3(%arg0: i32, %arg1: i32) -> (i32, i32) {
    %c0_i32 = arith.constant 0 : i32
    %c0_i32_0 = arith.constant 0 : i32
    %c0_i32_1 = arith.constant 0 : i32
    return %c0_i32, %c0_i32_0 : i32, i32
  }
  func.func @transform_4(%arg0: i32, %arg1: i32) -> (i32, i32) {
    %c0_i32 = arith.constant 0 : i32
    %c0_i32_0 = arith.constant 0 : i32
    %c0_i32_1 = arith.constant 0 : i32
    return %c0_i32, %c0_i32_0 : i32, i32
  }
  func.func @transform_5(%arg0: i32, %arg1: i32) -> (i32, i32, i32) {
    %c0_i32 = arith.constant 0 : i32
    %c0_i32_0 = arith.constant 0 : i32
    %c0_i32_1 = arith.constant 0 : i32
    %c0_i32_2 = arith.constant 0 : i32
    return %c0_i32, %c0_i32_0, %c0_i32_1 : i32, i32, i32
  }
  func.func @transform_6(%arg0: i32, %arg1: i32) -> (i32, i32, i32) {
    %c0_i32 = arith.constant 0 : i32
    %c0_i32_0 = arith.constant 0 : i32
    %c0_i32_1 = arith.constant 0 : i32
    %c0_i32_2 = arith.constant 0 : i32
    return %c0_i32, %c0_i32_0, %c0_i32_1 : i32, i32, i32
  }
  func.func @transform_7(%arg0: i32, %arg1: i32) -> (i32, i32) {
    %c0_i32 = arith.constant 0 : i32
    %c0_i32_0 = arith.constant 0 : i32
    %c0_i32_1 = arith.constant 0 : i32
    return %c0_i32, %c0_i32_0 : i32, i32
  }
  func.func @transform_8(%arg0: i32, %arg1: i32) -> (i32, i32) {
    %c0_i32 = arith.constant 0 : i32
    %c0_i32_0 = arith.constant 0 : i32
    %c0_i32_1 = arith.constant 0 : i32
    return %c0_i32, %c0_i32_0 : i32, i32
  }
  func.func @transform_9(%arg0: i32, %arg1: i32) -> (i32, i32) {
    %c0_i32 = arith.constant 0 : i32
    %c0_i32_0 = arith.constant 0 : i32
    %c0_i32_1 = arith.constant 0 : i32
    return %c0_i32, %c0_i32_0 : i32, i32
  }
  func.func @transform_10(%arg0: i32, %arg1: i32) -> (i32, i32) {
    %c0_i32 = arith.constant 0 : i32
    %c0_i32_0 = arith.constant 0 : i32
    %c0_i32_1 = arith.constant 0 : i32
    return %c0_i32, %c0_i32_0 : i32, i32
  }
  func.func @transform_11(%arg0: i32, %arg1: i32) -> (i32, i32, i32) {
    %c0_i32 = arith.constant 0 : i32
    %c0_i32_0 = arith.constant 0 : i32
    return %arg0, %arg1, %c0_i32 : i32, i32, i32
  }
}

</mosaic_0001>

<bundles_post_ra>
// kernel: tpu_custom_call.1
= control target key start
LH: loop header
LB: loop body
LE: loop exit
PB: predicated region body
PF: predicated region fallthrough
CT: control target
= control target key end

     0   :  { %s1830_s0 = inlined_call_operand.vmem [shape: bf16[2,16,32], index: 0, kind: input, shape index: {}]   ;;  %s1831_s1 = inlined_call_operand.hbm [shape: bf16[32,96], index: 1, kind: input, shape index: {}]   ;;  %s1832_s2 = inlined_call_operand.vmem [shape: f32[1,96], index: 2, kind: input, shape index: {}]   ;;  %s1833_s3 = inlined_call_operand.hbm [shape: f32[3,96], index: 3, kind: input, shape index: {}]   ;;  %s1834_s4 = inlined_call_operand.vmem [shape: f32[1,96], index: 4, kind: input, shape index: {}]   ;;  %s1835_s5 = inlined_call_operand.vmem [shape: f32[1,16,32], index: 5, kind: input, shape index: {}]   ;;  %s1836_s6 = inlined_call_operand.hbm [shape: f32[1,1,32], index: 6, kind: input, shape index: {}]   ;;  %s1837_s7 = inlined_call_operand.vmem [shape: bf16[32,8], index: 7, kind: input, shape index: {}]   ;;  %s1838_s8 = inlined_call_operand.hbm [shape: f32[1,8], index: 8, kind: input, shape index: {}]   ;;  %s1839_s9 = inlined_call_operand.vmem [shape: bf16[32,32], index: 9, kind: input, shape index: {}]   ;;  %s1840_s10 = inlined_call_operand.vmem [shape: f32[1,32], index: 10, kind: input, shape index: {}]   ;;  %s1841_s11 = inlined_call_operand.hbm [shape: f32[2,16,32], index: 11, kind: output, shape index: {}]  }
   0x1   :  { %1859 = sst [smem:[#allocation27_spill]] %s1833_s3 }
   0x2   :  { %1860 = sst [smem:[#allocation28_spill]] %s1839_s9 }
   0x3   :  { %1861 = sst [smem:[#allocation29_spill]] %s1840_s10 }
   0x4   :  { %1862 = sst [smem:[#allocation30_spill]] %s1841_s11 }
   0x5   :  { %16 = vsyncpa [#allocation5], 0 }
   0x6   :  { %17 = vsyncpa [#allocation8], 0 }
   0x7   :  { %18 = vsyncpa [#allocation11], 0 }
   0x8   :  { %19 = vsyncpa [#allocation6], 0 }
   0x9   :  { %21 = vsyncpa [#allocation6 + $0x1], 0  ;;  %s1508_s17 = smov 0   ;;  %s1510_s18 = smov 0  }
   0xa   :  { %s1512_s19 = smov 0   ;;  %s1514_s20 = smov 0  }
   0xb   :  { %s1516_s21 = smov 0   ;;  %s1518_s22 = smov 0  }
   0xc   :  { %s1520_s23 = smov 0   ;;  %s1522_s24 = smov 0  }
   0xd LB: > { %1863 = sst [smem:[#allocation17_spill]] %s1391_s17  ;;  %s953_s25 = sadd.s32 4294967295, %s1419_s24   ;;  %s1419_s24 = sphi %s1522_s24, %s27_s24   ;;  %s1415_s23 = sphi %s1520_s23, %s1900_s23   ;;  %s1411_s22 = sphi %s1518_s22, %s1896_s22   ;;  %s1407_s21 = sphi %s1516_s21, %s1895_s21   ;;  %s1403_s20 = sphi %s1514_s20, %s1894_s20   ;;  %s1399_s19 = sphi %s1512_s19, %s1893_s19   ;;  %s1395_s18 = sphi %s1510_s18, %s1899_s18   ;;  %s1391_s17 = sphi %s1508_s17, %s1898_s17  }
   0xe   : > { %1864 = sst [smem:[#allocation18_spill]] %s1399_s19  ;;  %s954_s26 = sadd.s32 4294967294, %s1419_s24  }
   0xf   : > { %1865 = sst [smem:[#allocation19_spill]] %s1411_s22  ;;  %s36_s27 = sadd.s32 1, %s1411_s22 }
  0x10   : > { %1866 = sst [smem:[#allocation20_spill]] %s1415_s23  ;;  %s39_s28 = sadd.s32 1, %s1415_s23 }
  0x11   : > { %1867 = sst [smem:[#allocation21_spill]] %s1419_s24  ;;  %p37_p0 = scmp.ge.s32.totalorder %s36_s27, 2 }
  0x12   : > { %s286_s29 = sadd.s32 1, %s1399_s19  ;;  %p296_p1 = scmp.ne.s32.totalorder %s1399_s19, %s1395_s18 }
  0x13   : > { %p297_p2 = scmp.eq.s32.totalorder %s953_s25, 3  ;;  %s1902_s27 = smov (%p37_p0, %s36_s27), 0 }
  0x14   : > { %1868 = sst [smem:[#allocation22_spill]] %s1902_s27  ;;  %s1904_s28 = smov (!%p37_p0, %s39_s28), %s1415_s23 }
  0x15   : > { %s282_s30 = ssub.s32 %s1411_s22, %s1902_s27  ;;  %p1560_p3 = por %p297_p2, %p296_p1 }
  0x16   : > { %p41_p4 = scmp.ge.s32.totalorder %s1904_s28, 2  ;;  %p302_p5 = scmp.ne.s32.totalorder %s1395_s18, %s1391_s17 }
  0x17   : > { %s1869_s12 = scalar_select %p1560_p3, 1, 0 }
  0x18   : > { %p303_p6 = scmp.eq.s32.totalorder %s954_s26, 3  ;;  %p955_p7 = scmp.ge.s32.totalorder %s1419_s24, 1 }
  0x19   : > { %1870 = sst [smem:[#allocation23_spill]] %s1869_s12  ;;  %s1906_s28 = smov (%p41_p4, %s1904_s28), 0 }
  0x1a   : > { %1871 = sst [smem:[#allocation24_spill]] %s1906_s28  ;;  %p1569_p8 = por %p303_p6, %p302_p5 }
  0x1b   : > { %p310_p9 = scmp.lt.s32.totalorder %s1419_s24, 5  ;;  %s281_s14 = ssub.s32 %s1415_s23, %s1906_s28 }
  0x1c   : > { %s1872_s13 = scalar_select %p1569_p8, 1, 0 }
  0x1d   : > { %s283_s15 = sor.u32 %s282_s30, %s281_s14  ;;  %p1576_p10 = pnand %p955_p7, %p310_p9 }
  0x1e   : > { %1873 = sst [smem:[#allocation25_spill]] %s1872_s13  ;;  %p284_p11 = scmp.eq.s32.totalorder %s283_s15, 0 }
  0x1f   : > { %s1874_s16 = scalar_select %p1576_p10, 1, 0 }
  0x20   : > { %p1580_p12 = scmp.eq.s32.totalorder %s953_s25, 0  ;;  %p1051_p13 = pneg %p1576_p10 }
  0x21   : > { %s1587_s26 = scalar_select %p284_p11, %s1399_s19, %s286_s29  }
  0x22   : > { %s1875_s27 = scalar_select %p1580_p12, 1, 0 }
  0x23   : > { %1876 = sst [smem:[#allocation26_spill]] %s1587_s26  ;;  %p1591_p0 = pnand %p1580_p12, %p1051_p13 }
  0x24   : > { %s1433_s30 = smov [#allocation7]   ;;  %s1878_s3 = sld [smem:[#allocation27_spill]] }
  0x25   : > { %s339_s14 = sshll.u32 %s1433_s30, 4  ;;  %p1603_p2 = pneg %p1591_p0  ;;  %s340_s14 = int_to_ptr.vmem [resolvable:$true] %s339_s14 }
  0x2a   : > { %s1189_s25 = scalar_lea.hbm %s1878_s3, 64 }
  0x2b   : > { %p1190_p1 = scmp.ne.s32.totalorder %s1878_s3, %s1189_s25  ;;  %p1196_p6 = scmp.lt.u32.totalorder %s1189_s25, %s1878_s3 }
  0x2d   : > { %p1192_p4 = pnand %p1603_p2, %p1190_p1 }
  0x2f   : > { %p1193_p5 = pneg %p1192_p4 }
  0x31   : > { %p1198_p7 = pnand %p1196_p6, %p1193_p5 }
  0x33   : > { %1201 = shalt.err (!%p1198_p7)
}
  0x34   : > { %s1202_s28 = scalar_lea.vmem %s340_s14, 64  ;;  %p1210_p8 = scmp.lt.s32.totalorder %s340_s14, %s340_s14 }
  0x35   : > { %p1203_p9 = scmp.ne.s32.totalorder %s340_s14, %s1202_s28  ;;  %p1211_p3 = scmp.lt.s32.totalorder %s1202_s28, %s1202_s28 }
  0x37   : > { %p1205_p11 = pnand %p1203_p9, %p1603_p2  ;;  %p1212_p12 = por %p1211_p3, %p1210_p8 }
  0x39   : > { %p1206_p13 = pneg %p1205_p11 }
  0x3b   : > { %p1213_p10 = pnand %p1212_p12, %p1206_p13 }
  0x3d   : > { %1216 = shalt.err (!%p1213_p10)
}
  0x3e   : > { %1057 = dma.hbm_to_vmem [thread:$0]  (!%p1591_p0), %s1878_s3, 64, %s340_s14, [#allocation8]  }
  0x3f   : > { %s1434_s26 = smov [#allocation4]   ;;  %s1217_s19 = scalar_lea.hbm %s1831_s1, 256 }
  0x40   : > { %s322_s15 = sshll.u32 %s1434_s26, 4  ;;  %p1218_p3 = scmp.ne.s32.totalorder %s1831_s1, %s1217_s19  ;;  %s323_s15 = int_to_ptr.vmem [resolvable:$true] %s322_s15 }
  0x41   : > { %p1224_p12 = scmp.lt.u32.totalorder %s1217_s19, %s1831_s1 }
  0x42   : > { %p1220_p8 = pnand %p1218_p3, %p1603_p2 }
  0x44   : > { %p1221_p10 = pneg %p1220_p8 }
  0x46   : > { %p1226_p1 = pnand %p1224_p12, %p1221_p10 }
  0x48   : > { %1229 = shalt.err (!%p1226_p1)
}
  0x49   : > { %s1230_s14 = scalar_lea.vmem %s323_s15, 256  ;;  %p1238_p7 = scmp.lt.s32.totalorder %s323_s15, %s323_s15 }
  0x4a   : > { %p1231_p4 = scmp.ne.s32.totalorder %s323_s15, %s1230_s14  ;;  %p1239_p9 = scmp.lt.s32.totalorder %s1230_s14, %s1230_s14 }
  0x4c   : > { %p1233_p5 = pnand %p1231_p4, %p1603_p2  ;;  %p1240_p11 = por %p1239_p9, %p1238_p7 }
  0x4e   : > { %p1234_p6 = pneg %p1233_p5 }
  0x50   : > { %p1241_p13 = pnand %p1240_p11, %p1234_p6 }
  0x52   : > { %1244 = shalt.err (!%p1241_p13)
}
  0x53   : > { %s1435_s17 = smov 64   ;;  %s1436_s24 = smov 4  }
  0x54   : > { %1054 = dma.hbm_to_vmem [thread:$0]  (!%p1591_p0), %s1831_s1, 256, %s323_s15, [#allocation5], %s1435_s17, %s1435_s17, %s1436_s24  }
  0x55   : > { %s1437_s23 = smov [#allocation9]   ;;  %s1438_s26 = smov [#allocation10]  }
  0x56   : > { %s356_s13 = sshll.u32 %s1437_s23, 4  ;;  %s370_s25 = sshll.u32 %s1438_s26, 4  ;;  %s357_s13 = int_to_ptr.vmem [resolvable:$true] %s356_s13  ;;  %s371_s25 = int_to_ptr.vmem [resolvable:$true] %s370_s25 }
  0x57   : > { %s1245_s14 = scalar_lea.hbm %s1836_s6, 16 }
  0x58   : > { %p1246_p3 = scmp.ne.s32.totalorder %s1836_s6, %s1245_s14  ;;  %p1252_p12 = scmp.lt.u32.totalorder %s1245_s14, %s1836_s6 }
  0x5a   : > { %p1248_p8 = pnand %p1246_p3, %p1603_p2 }
  0x5c   : > { %p1249_p10 = pneg %p1248_p8 }
  0x5e   : > { %p1254_p1 = pnand %p1252_p12, %p1249_p10 }
  0x60   : > { %1257 = shalt.err (!%p1254_p1)
}
  0x61   : > { %s1258_s15 = scalar_lea.vmem %s357_s13, 16  ;;  %s1265_s17 = scalar_lea.vmem %s357_s13, 32 }
  0x62   : > { %p1259_p4 = scmp.ne.s32.totalorder %s357_s13, %s1258_s15  ;;  %p1266_p7 = scmp.lt.s32.totalorder %s357_s13, %s357_s13 }
  0x63   : > { %p1267_p9 = scmp.lt.s32.totalorder %s1265_s17, %s1258_s15 }
  0x64   : > { %p1261_p5 = pnand %p1259_p4, %p1603_p2 }
  0x65   : > { %p1268_p11 = por %p1267_p9, %p1266_p7 }
  0x66   : > { %p1262_p6 = pneg %p1261_p5 }
  0x68   : > { %p1269_p13 = pnand %p1268_p11, %p1262_p6 }
  0x6a   : > { %1272 = shalt.err (!%p1269_p13)
}
  0x6b   : > { %1060 = dma.hbm_to_vmem [thread:$0]  (!%p1591_p0), %s1836_s6, 16, %s357_s13, [#allocation8]  }
  0x6c   : > { %s1273_s24 = scalar_lea.hbm %s1838_s8, 16 }
  0x6d   : > { %p1274_p3 = scmp.ne.s32.totalorder %s1838_s8, %s1273_s24  ;;  %p1280_p12 = scmp.lt.u32.totalorder %s1273_s24, %s1838_s8 }
  0x6f   : > { %p1276_p8 = pnand %p1274_p3, %p1603_p2 }
  0x71   : > { %p1277_p10 = pneg %p1276_p8 }
  0x73   : > { %p1282_p1 = pnand %p1280_p12, %p1277_p10 }
  0x75   : > { %1285 = shalt.err (!%p1282_p1)
}
  0x76   : > { %s1286_s30 = scalar_lea.vmem %s371_s25, 16  ;;  %s1293_s13 = scalar_lea.vmem %s371_s25, 32 }
  0x77   : > { %p1287_p4 = scmp.ne.s32.totalorder %s371_s25, %s1286_s30  ;;  %p1294_p7 = scmp.lt.s32.totalorder %s371_s25, %s371_s25 }
  0x78   : > { %p1295_p9 = scmp.lt.s32.totalorder %s1293_s13, %s1286_s30 }
  0x79   : > { %p1289_p5 = pnand %p1287_p4, %p1603_p2 }
  0x7a   : > { %p1296_p11 = por %p1295_p9, %p1294_p7 }
  0x7b   : > { %p1290_p6 = pneg %p1289_p5 }
  0x7d   : > { %p1297_p13 = pnand %p1296_p11, %p1290_p6 }
  0x7f   : > { %1300 = shalt.err (!%p1297_p13)
}
  0x80   : > { %1063 = dma.hbm_to_vmem [thread:$0]  (!%p1591_p0), %s1838_s8, 16, %s371_s25, [#allocation11]  }
  0x81   : > { %p1880_p3 = scmp.ne.s32.totalorder %s1874_s16, 0 }
  0x82   : > { %p1881_p8 = scmp.ne.s32.totalorder (!%p1880_p3), %s1875_s27, 0 }
  0x83   : > { %400 = sbr.rel (%p1880_p3) target bundleno = 2118 (0x846), region = 64 }
  0x8a   : > { %1374 = dma.done.wait (%p1881_p8), [#allocation5], 256  }
  0x8b   : > { %1376 = vsyncadd (%p1881_p8), [#allocation5], 4294967040 }
  0x8c   : > { %1378 = dma.done.wait (%p1881_p8), [#allocation8], 80  }
  0x8d   : > { %1380 = vsyncadd (%p1881_p8), [#allocation8], 4294967216 }
  0x8e   : > { %1382 = dma.done.wait (%p1881_p8), [#allocation11], 16  }
  0x8f   : > { %1384 = vsyncadd (%p1881_p8), [#allocation11], 4294967280  ;;  %s452_s22 = sand.u32 1, %s1395_s18   ;;  %p455_p0 = scmp.lt.s32.totalorder %s1407_s21, 1 }
  0x90   : > { %s1691_s16 = sshll.u32 %s452_s22, 3  ;;  %p457_p2 = scmp.lt.s32.totalorder %s1403_s20, 1 }
  0x91   : > { %s456_s29 = scalar_select %p455_p0, %s1407_s21, 1 }
  0x92   : > { %s458_s25 = scalar_select %p457_p2, %s1403_s20, 1 }
  0x93   : > { %s967_s15 = sshll.u32 %s456_s29, 1  ;;  %s454_s12 = scalar_lea.vmem [#allocation12], %s1691_s16 }
  0x94   : > { %s460_s17 = sadd.s32 %s967_s15, %s458_s25  ;;  %p969_p10 = scmp.ne.s32.totalorder %s1403_s20, 0 }
  0x95   : > { %s968_s3 = sshll.u32 %s460_s17, 2  ;;  %vm468_vm0 = vcmask (!%p969_p10), 779264   ;;  %vm470_vm1 = vcmask (!%p969_p10), 261120   ;;  %v1439_v0 = vmov (!%p969_p10), 0.0  }
  0x96   : > { %s462_s9 = scalar_lea.vmem %s1830_s0, %s968_s3  ;;  %467 = sbr.rel (%p969_p10) target bundleno = 157 (0x9d), region = 84  ;;  %469 = vst.msk [vmem:[#allocation2] sm:$0x3] (!%p969_p10), %vm468_vm0, %v1439_v0 }
  0x97   : > { %471 = vst.msk [vmem:[#allocation3] sm:$0xff] (!%p969_p10), %vm470_vm1, %v1439_v0 }
  0x9d PF: > { %v1179_v1 = vld [vmem:[#allocation4] sm:$0xff]   ;;  %v1440_v2 = vmov 0.0   ;;  %v1180_v3 = vld [vmem:[#allocation4 + $0x8] sm:$0xff]   ;;  %vm1441_vm2 = vmmov 0   ;;  %v1705_v4 = vld [vmem:[%s462_s9] sm:$0xf] }
  0x9e   : > { %1009 = vmatprep.subr.bf16.mxu0 %v1440_v2  ;;  %1013 = vmatprep.mubr.msk.bf16.mxu0 %vm1441_vm2, %v1440_v2  ;;  %vm496_vm3 = vcmask 261120   ;;  %v970_v5 = vld [vmem:[%s1832_s2] ss:$0 sm:$0xff]  ;;  %vm540_vm4 = vcmask 785408   ;;  %v975_v11 = vld [vmem:[#allocation7] ss:$0 sm:$0xff] }
  0x9f   : > { %1010 = vmatpush3.bf16.msra.mxu0 %v1179_v1  ;;  %vm573_vm5 = vcmask 785414   ;;  %s978_s19 = sshll.u32 %s1403_s20, 3  ;;  %v974_v12 = vld [vmem:[%s1834_s4] ss:$0 sm:$0xff]  ;;  %v976_v14 = vld [vmem:[#allocation7 + $0x1] ss:$0 sm:$0xff] }
  0xa0   : > { %1011 = vmatprep.subr.bf16.mxu0 %v1440_v2  ;;  %s1716_s30 = sadd.s32 8, %s978_s19  ;;  %v977_v17 = vld [vmem:[#allocation7 + $0x2] ss:$0 sm:$0xff]  ;;  %s1442_s13 = smov 32   ;;  %v981_v26 = vld [vmem:[#allocation9] ss:$0 sm:$0xff] }
  0xa1   : > { %s1443_s28 = smov 64   ;;  %s863_s14 = scalar_lea.vmem [#allocation3], %s978_s19 }
  0xa2   : > { %p983_p12 = scmp.le.s32.totalorder %s1716_s30, 0 }
  0xa3   : > { %1012 = vmatpush3.bf16.msra.mxu0 %v1180_v3  ;;  %s1425_s29 = smov (!%p983_p12), 0  }
  0xa6   : > { %1014 = vmatmul.mubr.msk.bf16.vlgmr.msra.gmra.mrb[0].mxu0 %vm496_vm3, %v1705_v4 }
 0x179   : > { %v534_v6 = vpop.f32.mrb[0].mxu0 }
 0x17a   : > { %v535_v7 = vadd.f32 %v970_v5, %v534_v6  ;;  %v1015_v8 = vpop.f32.mrb[1].mxu0 }
 0x17b   : > { %v537_v9 = vpop.f32.mrb[2].mxu0 }
 0x17c   : > { %541 = vst.msk [vmem:[#allocation2 + $0x2] sm:$0xff] %vm540_vm4, %v535_v7  ;;  %v1016_v10 = vpop.f32.mrb[3].mxu0 }
 0x183   : > { %v550_v13 = vld [vmem:[#allocation2] sm:$0xff] }
 0x184   : > { %v558_v15 = vld [vmem:[#allocation2 + $0x1] sm:$0xff]  ;;  %v555_v16 = vmul.f32 %v975_v11, %v550_v13 }
 0x185   : > { %574 = vst.msk [vmem:[#allocation2 - $0x6] sm:$0xc0] %vm573_vm5, %v535_v7  ;;  %v566_v18 = vld [vmem:[#allocation2 + $0x2] sm:$0xff]  ;;  %v563_v20 = vmul.f32 %v976_v14, %v558_v15 }
 0x186   : > { %v556_v19 = vadd.f32 %v974_v12, %v555_v16  ;;  %v571_v22 = vmul.f32 %v977_v17, %v566_v18 }
 0x188   : > { %v564_v21 = vadd.f32 %v563_v20, %v556_v19 }
 0x18a   : > { %v1718_v23 = vadd.f32 %v571_v22, %v564_v21 }
 0x18c   : > { %577 = vrot.lane.b32.xlu0 %v1718_v23, %s1442_s13 }
 0x1fe   : > { %v578_v24 = vpop.permute.xlu0 %577 }
 0x1ff   : > { %v580_v25 = vmul.f32 %v578_v24, %v1718_v23 }
 0x201   : > { %583 = vrot.lane.b32.xlu0 %v580_v25, %s1443_s28 }
 0x270   : > { %880 = sbr.rel (%p983_p12) target bundleno = 642 (0x282), region = 124 }
 0x273   : > { %v584_v27 = vpop.permute.xlu0 %583 }
 0x274   : > { %980 = vst.msk [vmem:[%s863_s14 + $0x8] sm:$0xff] %vm496_vm3, %v584_v27  ;;  %v595_v28 = vmul.f32 %v981_v26, %v584_v27  }
 0x276   : > { %v1429_v29 = vmov %v595_v28   ;;  %v1421_v30 = vmov (!%p983_p12), %v595_v28  }
 0x277 LB: >> { %s605_s17 = scalar_lea.vmem %s1835_s5, %s1427_s29  ;;  %s607_s3 = ssub.s32 %s1716_s30, %s1427_s29  ;;  %s1427_s29 = sphi %s1425_s29, %s601_s29   ;;  %v1423_v30 = vphi %v1421_v30, %v1422_v30  }
 0x278   : >> { %v984_v31 = vld [vmem:[%s605_s17] ss:$0 sm:$0xff]  ;;  %s608_s27 = scalar_lea.vmem [#allocation3], %s607_s3  ;;  %s601_s29 = sadd.s32 1, %s1427_s29  }
 0x279   : >> { %p600_p1 = scmp.ge.s32.totalorder %s601_s29, %s1716_s30 }
 0x27b   : >> { %v609_v32 = vld [vmem:[%s608_s27] sm:$0xff]  ;;  %603 = sbr.rel (!%p600_p1) target bundleno = 631 (0x277), region = 130 }
 0x27c   : >> { %v614_v33 = vmul.f32 %v984_v31, %v609_v32 }
 0x27e   : >> { %v615_v34 = vadd.f32 %v1423_v30, %v614_v33  }
 0x280   : >> { %v1422_v30 = vmov %v615_v34   ;;  %v1430_v29 = vmov (%p600_p1), %v615_v34  }
 0x282 PF: > { %1017 = vmatprep.subr.bf16.mxu1 %v1440_v2  ;;  %v1181_v35 = vld [vmem:[%s1837_s7] sm:$0xff]   ;;  %1021 = vmatprep.mubr.msk.bf16.mxu1 %vm1441_vm2, %v1440_v2  ;;  %v1182_v36 = vld [vmem:[%s1837_s7 + $0x8] sm:$0xff]   ;;  %v985_v37 = vld [vmem:[#allocation10] ss:$0 sm:$0xff]  ;;  %vm682_vm6 = vcmask 64512   ;;  %v680_v44 = vlaneseq  ;;  %s1882_s26 = sld [smem:[#allocation28_spill]]  ;;  %v616_v14 = vmul.f32 %v1431_v29, %v1718_v23  ;;  %v1431_v29 = vphi %v1429_v29, %v1430_v29  }
 0x283   : > { %1025 = vmatprep.subr.bf16.mxu0 %v1440_v2  ;;  %1029 = vmatprep.mubr.msk.bf16.mxu0 %vm1441_vm2, %v1440_v2  ;;  %s1444_s28 = smov 16   ;;  %s1445_s14 = smov 8   ;;  %vm732_vm11 = vcmask 130048   ;;  %vm734_vm12 = vcmask 195584  }
 0x284   : > { %1018 = vmatpush3.bf16.msra.mxu1 %v1181_v35  ;;  %v681_v45 = vand.u32 127, %v680_v44  ;;  %s1446_s29 = smov 24   ;;  %s994_s25 = sshll.u32 %s1407_s21, 1 }
 0x285   : > { %1019 = vmatprep.subr.bf16.mxu1 %v1440_v2  ;;  %s1883_s15 = sld [smem:[#allocation23_spill]]  ;;  %s817_s17 = sadd.s32 %s1403_s20, %s994_s25 }
 0x286   : > { %s1884_s10 = sld [smem:[#allocation29_spill]]  ;;  %s995_s9 = sshll.u32 %s817_s17, 7 }
 0x287   : > { %s821_s24 = sshll.u32 %s454_s12, 4  ;;  %s1885_s23 = sld [smem:[#allocation30_spill]]  ;;  %s1774_s24 = int_to_ptr.vmem [resolvable:$true] %s821_s24 }
 0x288   : > { %1020 = vmatpush3.bf16.msra.mxu1 %v1182_v36  ;;  %v1183_v8 = vld [vmem:[%s1882_s26] sm:$0xff]   ;;  %v1184_v9 = vld [vmem:[%s1882_s26 + $0x8] sm:$0xff]   ;;  %s806_s20 = scalar_lea.sflag [#allocation6], %s452_s22  ;;  %s1301_s21 = scalar_lea.vmem %s1774_s24, 128 }
 0x289   : > { %1026 = vmatpush3.bf16.msra.mxu0 %v1183_v8  ;;  %p1302_p4 = scmp.ne.s32.totalorder %s1774_s24, %s1301_s21 }
 0x28a   : > { %1027 = vmatprep.subr.bf16.mxu0 %v1440_v2 }
 0x28b   : > { %1022 = vmatmul.mubr.msk.bf16.vlgmr.msra.gmra.mrb[0].mxu1 %vm496_vm3, %v1705_v4  ;;  %p1887_p5 = scmp.ne.s32.totalorder %s1883_s15, 0 }
 0x28c   : > { %v989_v20 = vld [vmem:[%s1884_s10] ss:$0 sm:$0xff] }
 0x28d   : > { %1028 = vmatpush3.bf16.msra.mxu0 %v1184_v9  ;;  %s1886_s30 = smov %s1885_s23  ;;  %s1772_s13 = scalar_lea.hbm %s1885_s23, %s995_s9 }
 0x28e   : > { %p1303_p6 = pnand %p1302_p4, %p1887_p5 }
 0x290   : > { %p1304_p7 = pneg %p1303_p6 }
 0x35e   : > { %v674_v38 = vpop.f32.mrb[0].mxu1 }
 0x35f   : > { %v675_v39 = vadd.f32 %v985_v37, %v674_v38  ;;  %v1023_v40 = vpop.f32.mrb[1].mxu1 }
 0x360   : > { %v677_v41 = vpop.f32.mrb[2].mxu1 }
 0x361   : > { %v1024_v42 = vpop.f32.mrb[3].mxu1  ;;  %v683_v43 = vsel %vm682_vm6, %v675_v39, -inf }
 0x362   : > { %684 = vmax.xlane.f32.xlu0 %v683_v43 }
 0x3ef   : > { %v685_v46 = vpop.xlane.xlu0 %684 }
 0x3f0   : > { %vm686_vm7 = vcmp.eq.f32.partialorder %v675_v39, %v685_v46 }
 0x3f1   : > { %v687_v47 = vsel %vm686_vm7, %v681_v45, 8 }
 0x3f2   : > { %v688_v48 = vsel %vm682_vm6, %v687_v47, 2147483647 }
 0x3f3   : > { %v690_v49 = vshra.s32 %v688_v48, 16  ;;  %v689_v51 = vand.u32 65535, %v688_v48 }
 0x3f5   : > { %v692_v50 = vcvt.s32.f32 %v690_v49  ;;  %v691_v53 = vcvt.s32.f32 %v689_v51 }
 0x3f7   : > { %693 = vmin.xlane.f32.xlu0 %v692_v50 }
 0x484   : > { %v694_v52 = vpop.xlane.xlu0 %693 }
 0x485   : > { %vm695_vm8 = vcmp.eq.f32.partialorder %v692_v50, %v694_v52  ;;  %v700_v55 = vcvt.f32.s32 %v694_v52 }
 0x486   : > { %v696_v54 = vsel %vm695_vm8, %v691_v53, inf }
 0x487   : > { %697 = vmin.xlane.f32.xlu1 %v696_v54  ;;  %v701_v57 = vshll.u32 %v700_v55, 16 }
 0x514   : > { %v698_v56 = vpop.xlane.xlu1 %697 }
 0x515   : > { %v699_v58 = vcvt.f32.s32 %v698_v56 }
 0x517   : > { %v702_v59 = vadd.s32 %v701_v57, %v699_v58 }
 0x519   : > { %vm703_vm9 = vcmp.eq.s32.totalorder %v681_v45, %v702_v59 }
 0x51a   : > { %v704_v60 = vsel %vm703_vm9, -inf, %v675_v39 }
 0x51b   : > { %v705_v61 = vsel %vm682_vm6, %v704_v60, -inf }
 0x51c   : > { %706 = vmax.xlane.f32.xlu1 %v705_v61 }
 0x5a9   : > { %v707_v62 = vpop.xlane.xlu1 %706 }
 0x5aa   : > { %vm708_vm10 = vcmp.lt.f32.partialorder %v675_v39, %v707_v62 }
 0x5ab   : > { %v709_v63 = vsel %vm708_vm10, 0.0, %v675_v39 }
 0x5ac   : > { %v710_v0 = vsel %vm682_vm6, %v709_v63, -inf }
 0x5ad   : > { %711 = vmax.xlane.f32.xlu0 %v710_v0 }
 0x63a   : > { %v712_v1 = vpop.xlane.xlu0 %711 }
 0x63b   : > { %v713_v3 = vsub.f32 %v709_v63, %v712_v1 }
 0x63d   : > { %v714_v4 = vmul.f32 1.442695, %v713_v3 }
 0x63f   : > { %1185 = vpow2.f32 %v714_v4 }
 0x649   : > { %v1186_v5 = vpop.eup %1185 }
 0x64a   : > { %v716_v6 = vsel %vm682_vm6, %v1186_v5, 0.0 }
 0x64b   : > { %717 = vadd.xlane.f32.xlu1 %v716_v6 }
 0x6d8   : > { %v718_v7 = vpop.xlane.xlu1 %717 }
 0x6d9   : > { %1187 = vrcp.f32 %v718_v7 }
 0x6e3   : > { %v1188_v10 = vpop.eup %1187 }
 0x6e4   : > { %v720_v11 = vmul.f32 %v1188_v10, %v1186_v5 }
 0x6e6   : > { %725 = vrot.lane.b32.xlu1 %v720_v11, %s1444_s28  ;;  %722 = vrot.lane.b32.xlu0 %v720_v11, %s1445_s14  ;;  %s1447_s28 = smov [#allocation12]  }
 0x6e7   : > { %s1305_s14 = sshll.u32 %s1447_s28, 4  ;;  %s1306_s14 = int_to_ptr.vmem [resolvable:$false] %s1305_s14 }
 0x6e8   : > { %p1308_p9 = scmp.lt.s32.totalorder %s1774_s24, %s1306_s14 }
 0x6ea   : > { %728 = vrot.lane.b32.xlu1 %v720_v11, %s1446_s29  ;;  %s1307_s29 = scalar_lea.vmem %s1306_s14, 256 }
 0x6eb   : > { %p1309_p11 = scmp.lt.s32.totalorder %s1307_s29, %s1301_s21 }
 0x6ed   : > { %p1310_p13 = por %p1309_p11, %p1308_p9 }
 0x6ef   : > { %p1311_p3 = pnand %p1310_p13, %p1304_p7 }
 0x758   : > { %v726_v12 = vpop.permute.xlu1 %725  ;;  %v723_v13 = vpop.permute.xlu0 %722 }
 0x759   : > { %v731_v2 = vsel %vm682_vm6, %v720_v11, %v723_v13 }
 0x75a   : > { %v733_v16 = vsel %vm732_vm11, %v731_v2, %v726_v12 }
 0x75c   : > { %v729_v15 = vpop.permute.xlu1 %728 }
 0x75d   : > { %v735_v17 = vsel %vm734_vm12, %v733_v16, %v729_v15 }
 0x75e   : > { %v736_v18 = vmul.f32 %v735_v17, %v616_v14 }
 0x760   : > { %v737_v19 = vpack.c.bf16 %v736_v18, %v736_v18 }
 0x762   : > { %1030 = vmatmul.mubr.msk.bf16.vlgmr.msra.gmra.mrb[4].mxu0 %vm496_vm3, %v737_v19 }
 0x835   : > { %v798_v21 = vpop.f32.mrb[4].mxu0 }
 0x836   : > { %v799_v22 = vadd.f32 %v989_v20, %v798_v21  ;;  %v1031_v23 = vpop.f32.mrb[5].mxu0 }
 0x837   : > { %v801_v24 = vpop.f32.mrb[6].mxu0 }
 0x838   : > { %804 = vst.msk [vmem:[%s454_s12] sm:$0xff] %vm496_vm3, %v799_v22  ;;  %v1032_v25 = vpop.f32.mrb[7].mxu0 }
 0x839   : > { %1314 = shalt.err (!%p1311_p3)
}
 0x83a   : > { %s1315_s22 = scalar_lea.hbm %s1772_s13, 128  ;;  %s1319_s25 = scalar_lea.hbm %s1886_s30, 512 }
 0x83b   : > { %p1316_p8 = scmp.ne.s32.totalorder %s1772_s13, %s1315_s22  ;;  %p1320_p10 = scmp.lt.u32.totalorder %s1772_s13, %s1886_s30 }
 0x83c   : > { %p1321_p12 = scmp.lt.u32.totalorder %s1319_s25, %s1315_s22  ;;  %p1323_p4 = scmp.lt.u32.totalorder %s1315_s22, %s1772_s13 }
 0x83d   : > { %p1317_p0 = pnand %p1316_p8, %p1887_p5 }
 0x83e   : > { %p1322_p1 = por %p1321_p12, %p1320_p10 }
 0x83f   : > { %p1318_p2 = pneg %p1317_p0 }
 0x840   : > { %p1324_p6 = por %p1323_p4, %p1322_p1 }
 0x842   : > { %p1325_p7 = pnand %p1324_p6, %p1318_p2 }
 0x844   : > { %1328 = shalt.err (!%p1325_p7)
}
 0x845   : > { %1049 = dma.vmem_to_hbm [thread:$0]  (%p1887_p5), %s1774_s24, 128, %s1772_s13, %s806_s20  }
 0x846 PF: > { %s1888_s27 = sld [smem:[#allocation21_spill]]  ;;  %s1889_s10 = sld [smem:[#allocation17_spill]] }
 0x847   : > { %s1890_s9 = sld [smem:[#allocation25_spill]] }
 0x84c   : > { %p1076_p9 = scmp.ge.s32.totalorder %s1888_s27, 2  ;;  %s833_s11 = sand.u32 1, %s1889_s10  }
 0x84d   : > { %p1891_p11 = scmp.ne.s32.totalorder %s1890_s9, 0  ;;  %s834_s19 = scalar_lea.sflag [#allocation6], %s833_s11 }
 0x84f   : > { %p1065_p13 = pnand %p1076_p9, %p1891_p11 }
 0x851   : > { %1386 = dma.done.wait (!%p1065_p13), %s834_s19, 128  }
 0x852   : > { %1388 = vsyncadd (!%p1065_p13), %s834_s19, 4294967168  ;;  %s27_s24 = sadd.s32 1, %s1888_s27   ;;  %s1892_s23 = sld [smem:[#allocation18_spill]] }
 0x853   : > { %p24_p3 = scmp.ge.s32.totalorder %s27_s24, 6   ;;  %s1893_s19 = sld [smem:[#allocation26_spill]] }
 0x854   : > { %s1894_s20 = sld [smem:[#allocation19_spill]]  ;;  %s1895_s21 = sld [smem:[#allocation20_spill]] }
 0x855   : > { %s1896_s22 = sld [smem:[#allocation22_spill]]  ;;  %s1897_s15 = sld [smem:[#allocation24_spill]] }
 0x856   : > { %s1898_s17 = smov %s1395_s18  ;;  %26 = sbr.rel (!%p24_p3) target bundleno = 13 (0xd), region = 141 }
 0x858   : > { %s1899_s18 = smov %s1892_s23 }
 0x85b   : > { %s1900_s23 = smov %s1897_s15 }
 0x85d   :  { %839 = vsyncpa [#allocation5], 1 }
 0x85e   :  { %841 = vsyncpa [#allocation5 + $0x1], 1 }
 0x85f   :  { %842 = vsyncpa [#allocation8], 1 }
 0x860   :  { %843 = vsyncpa [#allocation11], 1 }
 0x861   :  { %844 = vsyncpa [#allocation6], 1 }
 0x862   :  { %846 = vsyncpa [#allocation6 + $0x1], 1 }

</bundles_post_ra>
